<compile_context>
chip_gen: v6e
topology: v6e:2x2x1
jax: 0.10.0
libtpu: 0.0.40
codegen_flags: <defaults>
</compile_context>

<pallas_src>
import jax
import jax.numpy as jnp
from jax.experimental import pallas as pl
from jax.experimental.pallas import tpu as pltpu

NEG_SLOPE = 0.2      # HCAN negative_slope default
LANE = 128           # TPU lane width
TILE_N = 256         # nodes per grid step of the fused kernel
TILE_M = 256         # row tile of the input Linear


def _round_up(x, m):
    return (x + m - 1) // m * m


# --------------------------- Pallas kernels ---------------------------------

def _linear_bias_kernel(x_ref, w_ref, b_ref, o_ref):
    # y = x @ w + b   (input_linears['0'] of group_input); bf16 MXU, f32 acc.
    acc = jnp.dot(x_ref[...].astype(jnp.bfloat16), w_ref[...],
                  preferred_element_type=jnp.float32)
    o_ref[...] = acc + b_ref[...]


def linear_bias(x, w_bf16, b):
    """x: (M, K) f32 with M % TILE_M == 0, w: (K, D) bf16, b: (D,) f32 -> (M, D) f32."""
    M, K = x.shape
    D = w_bf16.shape[1]
    return pl.pallas_call(
        _linear_bias_kernel,
        out_shape=jax.ShapeDtypeStruct((M, D), jnp.float32),
        grid=(M // TILE_M,),
        in_specs=[pl.BlockSpec((TILE_M, K), lambda i: (i, 0)),
                  pl.BlockSpec((K, D), lambda i: (0, 0)),   # weight stays resident
                  pl.BlockSpec((1, D), lambda i: (0, 0))],
        out_specs=pl.BlockSpec((TILE_M, D), lambda i: (i, 0)),
        compiler_params=pltpu.CompilerParams(
            dimension_semantics=("parallel",)),
    )(x, w_bf16, b.reshape(1, D))


def _hcan_fused_kernel(sel_ref, row_ref, x0_hbm, emb_hbm, w0_ref, w1p_ref,
                       o_ref, gbuf, sem):
    """Per node tile:
         DMA-gather TILE_N rows from one of two HBM tables (SMEM-prefetched
         select + row indices), double-buffered across grid steps with one
         aggregate semaphore wait per tile
         -> layer0 matmul (bf16 MXU, f32 acc) -> leaky_relu
         -> folded (layer1 @ proj^T) matmul -> lane-dense f32 output tile.
    """
    o = pl.program_id(0)          # "parallel" axis (megacore / 2-TC sharding)
    t = pl.program_id(1)          # "arbitrary" axis (sequential per core)
    n_inner = pl.num_programs(1)
    tile = o * n_inner + t
    slot = t & 1                  # double-buffer slot holding the current tile

    def issue_gather(tile_idx, dst_slot):
        # Issues TILE_N single-row HBM->VMEM copies into gbuf rows
        # [dst_slot*TILE_N, dst_slot*TILE_N + TILE_N).  All copies signal
        # sem[dst_slot]; completion is observed with ONE aggregate wait sized
        # as the whole slot (DMA semaphores count bytes).  Rows complete in
        # arbitrary order, so the slot must not be read before that wait.
        base = tile_idx * TILE_N
        dst_base = dst_slot * TILE_N

        @pl.loop(0, TILE_N)
        def _issue(n):
            # scalar SMEM reads happen before any .wait() in the kernel body
            src_row = row_ref[base + n]
            from_emb = sel_ref[base + n]

            @pl.when(from_emb == 0)
            def _():
                pltpu.make_async_copy(x0_hbm.at[pl.ds(src_row, 1)],
                                      gbuf.at[pl.ds(dst_base + n, 1)],
                                      sem.at[dst_slot]).start()

            @pl.when(from_emb != 0)
            def _():
                pltpu.make_async_copy(emb_hbm.at[pl.ds(src_row, 1)],
                                      gbuf.at[pl.ds(dst_base + n, 1)],
                                      sem.at[dst_slot]).start()

    # Pipeline prologue: prime the current slot on the first inner step of this
    # core's block (inner index restarts at 0 for every outer index, so this
    # fires correctly on every core under megacore sharding).
    @pl.when(t == 0)
    def _():
        issue_gather(tile, slot)

    # Prefetch the next tile's rows into the other slot / other semaphore; these
    # DMAs overlap with the wait + matmuls + writeback below.
    @pl.when(t + 1 < n_inner)
    def _():
        issue_gather(tile + 1, 1 - slot)

    # One aggregate wait for the whole current slot (TILE_N rows' worth of bytes).
    cur = pl.multiple_of(slot * TILE_N, TILE_N)
    cur_view = gbuf.at[pl.ds(cur, TILE_N)]
    pltpu.make_async_copy(cur_view, cur_view, sem.at[slot]).wait()

    # TODO(synk): HCANLayer internals not provided; dense per-node transform
    # stands in for the relational attention aggregation of each layer.
    h = jnp.dot(gbuf[pl.ds(cur, TILE_N), :].astype(jnp.bfloat16), w0_ref[...],
                preferred_element_type=jnp.float32)
    # F.leaky_relu between layers (applied for all but the last layer)
    h = jnp.where(h > 0, h, NEG_SLOPE * h)
    # last layer and 'proj' decoder are both linear -> folded into one weight
    o_ref[...] = jnp.dot(h.astype(jnp.bfloat16), w1p_ref[...],
                         preferred_element_type=jnp.float32)


def hcan_fused(sel, row, x0_proj, emb_tab, w0, w1p, n_outer, n_inner):
    """sel/row: (n_pad,) int32 (scalar-prefetched to SMEM);
       x0_proj: (M0, Dp) f32 HBM; emb_tab: (Re, Dp) f32 HBM;
       w0: (Dp, Hp) bf16; w1p: (Hp, Op) bf16
       -> (n_pad, Op) f32 with n_pad = n_outer * n_inner * TILE_N."""
    dp = x0_proj.shape[1]
    hp = w0.shape[1]
    op = w1p.shape[1]
    grid_spec = pltpu.PrefetchScalarGridSpec(
        num_scalar_prefetch=2,                                        # sel, row -> SMEM
        grid=(n_outer, n_inner),
        in_specs=[pl.BlockSpec(memory_space=pl.ANY),                  # x0_proj stays in HBM
                  pl.BlockSpec(memory_space=pl.ANY),                  # emb slab stays in HBM
                  pl.BlockSpec((dp, hp), lambda o, t, s, r: (0, 0)),  # resident weights
                  pl.BlockSpec((hp, op), lambda o, t, s, r: (0, 0))],
        out_specs=pl.BlockSpec((TILE_N, op),
                               lambda o, t, s, r: (o * n_inner + t, 0)),
        scratch_shapes=[pltpu.VMEM((2 * TILE_N, dp), jnp.float32),    # gather double-buffer
                        pltpu.SemaphoreType.DMA((2,))],               # one sem per slot
    )
    return pl.pallas_call(
        _hcan_fused_kernel,
        out_shape=jax.ShapeDtypeStruct((n_outer * n_inner * TILE_N, op), jnp.float32),
        grid_spec=grid_spec,
        compiler_params=pltpu.CompilerParams(
            dimension_semantics=("parallel", "arbitrary")),  # tiles shard across TCs
    )(sel, row, x0_proj, emb_tab, w0, w1p)


# --------------------------- param prep / wrapper ----------------------------

def xavier_normal(key, shape, gain):
    fan_out, fan_in = shape
    std = gain * (2.0 / (fan_in + fan_out)) ** 0.5
    return std * jax.random.normal(key, shape, dtype=jnp.float32)


def prepare_params(p):
    """One-time preparation: transposes, lane padding, the static [emb1; emb2]
    gather slab, w_layer1 @ proj fold, bf16 weight casts."""
    input_dim, in_feat0 = p["w_in0"].shape
    hid_dim = p["w_layer1"].shape[1]
    output_dim = p["w_proj"].shape[0]

    dp = _round_up(input_dim, LANE)     # padded input_dim
    fp = _round_up(in_feat0, LANE)      # padded raw-feature dim of type 0
    hp = _round_up(hid_dim, LANE)       # padded hid_dim
    op = _round_up(output_dim, LANE)    # padded output_dim (lane-dense out)

    # input_linears['0']: y = x @ W.T + b  -> pre-transposed, padded, bf16
    w_in0_t = jnp.zeros((fp, dp), jnp.float32).at[:in_feat0, :input_dim].set(p["w_in0"].T)
    b_in0 = jnp.zeros((dp,), jnp.float32).at[:input_dim].set(p["b_in0"])

    # static embedding slab [emb1; emb2], padded to lane width.  Built ONCE
    # here: there is no per-forward table concatenate any more.
    n1 = p["emb1"].shape[0]
    n2 = p["emb2"].shape[0]
    emb = jnp.zeros((n1 + n2, dp), jnp.float32)
    emb = emb.at[:n1, :input_dim].set(p["emb1"]).at[n1:, :input_dim].set(p["emb2"])

    # layer0 transform (stand-in for HCANLayer), padded + bf16
    w0 = jnp.zeros((dp, hp), jnp.float32).at[:input_dim, :hid_dim].set(p["w_layer0"])
    # fold layer1 and the 'proj' decoder (both linear, no nonlinearity between)
    w1p = p["w_layer1"] @ p["w_proj"].T                         # (hid_dim, output_dim)
    w1p = jnp.zeros((hp, op), jnp.float32).at[:hid_dim, :output_dim].set(w1p)

    return {
        "w_in0_t": w_in0_t.astype(jnp.bfloat16),
        "b_in0": b_in0,
        "emb": emb,                 # f32 gather source (row DMAs at arbitrary offsets)
        "n1": n1,
        "w0": w0.astype(jnp.bfloat16),
        "w1p": w1p.astype(jnp.bfloat16),
        "dims": (input_dim, in_feat0, hid_dim, output_dim, dp, fp, hp, op),
    }


def hcan_forward(prep, x_dict, node_type, local_node_idx):
    (input_dim, in_feat0, hid_dim, output_dim, dp, fp, hp, op) = prep["dims"]
    n1 = prep["n1"]

    # --- group_input --------------------------------------------------------
    x0 = x_dict[0]
    n0 = x0.shape[0]
    m_pad = _round_up(max(n0, 1), TILE_M)
    x0_p = jnp.zeros((m_pad, fp), jnp.float32).at[:n0, :in_feat0].set(x0)
    x0_proj = linear_bias(x0_p, prep["w_in0_t"], prep["b_in0"])          # (m_pad, dp)

    # use_norm=False -> no LayerNorm.  No per-forward table concatenate: the
    # fused kernel gathers rows directly from the two HBM-resident sources
    # (x0_proj and the static emb slab) via a (select, row) pair per node.
    n_emb = prep["emb"].shape[0]
    sel = (node_type != 0).astype(jnp.int32)                  # 0 -> x0_proj, 1 -> emb slab
    emb_row = jnp.where(node_type == 1, local_node_idx, local_node_idx + n1)
    # jnp.clip keeps the DMA bounds-safe; it silently masks genuinely invalid
    # (node_type, local_node_idx) pairs (same behavior as before, documented).
    row = jnp.where(sel == 0,
                    jnp.clip(local_node_idx, 0, m_pad - 1),
                    jnp.clip(emb_row, 0, n_emb - 1)).astype(jnp.int32)

    # F.dropout(p=input_dropout=0.0, training=False) -> identity.

    # --- layers + leaky_relu + folded proj decoder (fused Pallas kernel) -----
    n = node_type.shape[0]
    n_pad = _round_up(n, TILE_N)
    n_tiles = n_pad // TILE_N
    n_outer = 2 if (n_tiles % 2 == 0 and n_tiles >= 2) else 1   # feed both TCs when possible
    n_inner = n_tiles // n_outer

    sel_p = jnp.zeros((n_pad,), jnp.int32).at[:n].set(sel)      # padded rows gather
    row_p = jnp.zeros((n_pad,), jnp.int32).at[:n].set(row)      # x0_proj row 0 (harmless)

    out = hcan_fused(sel_p, row_p, x0_proj, prep["emb"], prep["w0"], prep["w1p"],
                     n_outer, n_inner)
    return out[:n, :output_dim]


if __name__ == "__main__":
    key = jax.random.PRNGKey(0)
    ks = jax.random.split(key, 8)

    # Small synthetic configuration consistent with HCAN.__init__
    num_nodes_dict = {0: 16, 1: 8, 2: 8}      # 3 node types, 32 nodes total
    input_dim, hid_dim, output_dim = 32, 32, 8
    in_feat0 = 16                             # x_ntypes=[0], input_dims={0: 16}
    gain = 2.0 ** 0.5                         # calculate_gain('relu')

    raw = {
        # input_linears['0'] : torch Linear weight (input_dim, in_feat0), bias
        "w_in0": xavier_normal(ks[0], (input_dim, in_feat0), gain),
        "b_in0": jnp.zeros((input_dim,), jnp.float32),
        # emb_dict for node types 1 and 2
        "emb1": xavier_normal(ks[1], (num_nodes_dict[1], input_dim), gain),
        "emb2": xavier_normal(ks[2], (num_nodes_dict[2], input_dim), gain),
        # per-layer dense transforms (stand-in for HCANLayer, see TODO)
        "w_layer0": xavier_normal(ks[3], (input_dim, hid_dim), gain),
        "w_layer1": xavier_normal(ks[4], (hid_dim, hid_dim), gain),
        # decoder 'proj': torch Linear weight (output_dim, hid_dim), bias=False
        "w_proj": xavier_normal(ks[5], (output_dim, hid_dim), gain),
    }
    prep = prepare_params(raw)

    # Raw features for node type 0
    x0 = jax.random.normal(ks[6], (num_nodes_dict[0], in_feat0), jnp.float32)

    # node_type / local_node_idx over N = 32 nodes (deterministic shuffle)
    types = ([0] * num_nodes_dict[0] + [1] * num_nodes_dict[1]
             + [2] * num_nodes_dict[2])
    perm = jax.random.permutation(ks[7], len(types))
    node_type_list = [types[int(i)] for i in perm]
    counters = {0: 0, 1: 0, 2: 0}
    local_idx_list = []
    for t in node_type_list:
        local_idx_list.append(counters[t])
        counters[t] += 1
    node_type = jnp.array(node_type_list, jnp.int32)
    local_node_idx = jnp.array(local_idx_list, jnp.int32)

    out = hcan_forward(prep, {0: x0}, node_type, local_node_idx)
    out = jax.block_until_ready(out)
    assert out.shape == (len(types), output_dim)
    assert out.dtype == jnp.float32

    # pure-JAX f32 reference of the same math (bf16 MXU inputs -> loose tol)
    x0_proj_ref = x0 @ raw["w_in0"].T + raw["b_in0"]
    table_ref = jnp.concatenate([x0_proj_ref, raw["emb1"], raw["emb2"]], axis=0)
    rows = jnp.array([0, num_nodes_dict[0], num_nodes_dict[0] + num_nodes_dict[1]],
                     jnp.int32)[node_type] + local_node_idx
    h_ref = table_ref[rows] @ raw["w_layer0"]
    h_ref = jnp.where(h_ref > 0, h_ref, NEG_SLOPE * h_ref)
    ref_out = (h_ref @ raw["w_layer1"]) @ raw["w_proj"].T
    assert jnp.allclose(out, ref_out, rtol=0.1, atol=0.2), "mismatch vs f32 reference"

    print("KERNEL_OK")
</pallas_src>

<mosaic_0001>
module attributes {stable_mosaic.version = 11 : i64} {
  func.func @_linear_bias_kernel(%arg0: i32, %arg1: memref<256x128xf32, #tpu.memory_space<vmem>>, %arg2: memref<128x128xbf16, #tpu.memory_space<vmem>>, %arg3: memref<1x128xf32, #tpu.memory_space<vmem>>, %arg4: memref<256x128xf32, #tpu.memory_space<vmem>>) attributes {dimension_semantics = [#tpu.dimension_semantics<parallel>], iteration_bounds = array<i64: 1>, scalar_prefetch = 0 : i64, scratch_operands = 0 : i64, tpu.core_type = #tpu.core_type<tc>, window_params = [{transform_indices = @transform_0, window_bounds = array<i64: 256, 128>}, {pipeline_mode = #tpu.pipeline_mode<synchronous>, transform_indices = @transform_1, window_bounds = array<i64: 128, 128>}, {pipeline_mode = #tpu.pipeline_mode<synchronous>, transform_indices = @transform_2, window_bounds = array<i64: 1, 128>}, {transform_indices = @transform_3, window_bounds = array<i64: 256, 128>}]} {
    %c0 = arith.constant 0 : index
    %c0_0 = arith.constant 0 : index
    %0 = vector.load %arg1[%c0, %c0_0] : memref<256x128xf32, #tpu.memory_space<vmem>>, vector<256x128xf32>
    %1 = arith.truncf %0 : vector<256x128xf32> to vector<256x128xbf16>
    %c0_1 = arith.constant 0 : index
    %c0_2 = arith.constant 0 : index
    %2 = vector.load %arg2[%c0_1, %c0_2] : memref<128x128xbf16, #tpu.memory_space<vmem>>, vector<128x128xbf16>
    %cst = arith.constant dense<0.000000e+00> : vector<256x128xf32>
    %3 = tpu.matmul %1, %2, %cst {dimension_numbers = #tpu.dot_dimension_numbers<[1], [0], [0], [1], [0, 0, 1, 1], [], []>} : vector<256x128xbf16>, vector<128x128xbf16>, vector<256x128xf32> -> vector<256x128xf32>
    %c0_3 = arith.constant 0 : index
    %c0_4 = arith.constant 0 : index
    %4 = vector.load %arg3[%c0_3, %c0_4] : memref<1x128xf32, #tpu.memory_space<vmem>>, vector<1x128xf32>
    %5 = vector.broadcast %4 : vector<1x128xf32> to vector<256x128xf32>
    %6 = arith.addf %3, %5 : vector<256x128xf32>
    %c0_5 = arith.constant 0 : index
    %c0_6 = arith.constant 0 : index
    %7 = vector.load %arg4[%c0_5, %c0_6] : memref<256x128xf32, #tpu.memory_space<vmem>>, vector<256x128xf32>
    tpu.vector_store %arg4[%c0_5, %c0_6], %6 {strides = array<i32>} : memref<256x128xf32, #tpu.memory_space<vmem>>, vector<256x128xf32>,
    return
  }
  func.func @transform_0(%arg0: i32) -> (i32, i32) {
    %c0_i32 = arith.constant 0 : i32
    %c0_i32_0 = arith.constant 0 : i32
    return %arg0, %c0_i32 : i32, i32
  }
  func.func @transform_1(%arg0: i32) -> (i32, i32) {
    %c0_i32 = arith.constant 0 : i32
    %c0_i32_0 = arith.constant 0 : i32
    %c0_i32_1 = arith.constant 0 : i32
    return %c0_i32, %c0_i32_0 : i32, i32
  }
  func.func @transform_2(%arg0: i32) -> (i32, i32) {
    %c0_i32 = arith.constant 0 : i32
    %c0_i32_0 = arith.constant 0 : i32
    %c0_i32_1 = arith.constant 0 : i32
    return %c0_i32, %c0_i32_0 : i32, i32
  }
  func.func @transform_3(%arg0: i32) -> (i32, i32) {
    %c0_i32 = arith.constant 0 : i32
    %c0_i32_0 = arith.constant 0 : i32
    return %arg0, %c0_i32 : i32, i32
  }
}

</mosaic_0001>

<bundles_post_ra>
// kernel: tpu_custom_call.1
= control target key start
LH: loop header
LB: loop body
LE: loop exit
PB: predicated region body
PF: predicated region fallthrough
CT: control target
= control target key end

     0   :  { %8 = vsyncpa [#allocation3], 0  ;;  %s631_s0 = inlined_call_operand.hbm [shape: f32[256,128], index: 0, kind: input, shape index: {}]   ;;  %s632_s1 = inlined_call_operand.hbm [shape: bf16[128,128], index: 1, kind: input, shape index: {}]   ;;  %s633_s2 = inlined_call_operand.vmem [shape: f32[1,128], index: 2, kind: input, shape index: {}]   ;;  %s634_s3 = inlined_call_operand.hbm [shape: f32[256,128], index: 3, kind: output, shape index: {}]  }
   0x1   :  { %9 = vsyncpa [#allocation6], 0 }
   0x2   :  { %10 = vsyncpa [#allocation4], 0  ;;  %s552_s12 = smov [#allocation2]  }
   0x3   :  { %s16_s13 = sshll.u32 %s552_s12, 4  ;;  %s17_s13 = int_to_ptr.vmem [resolvable:$true] %s16_s13 }
   0x4   :  { %s494_s14 = scalar_lea.vmem %s17_s13, 4096  ;;  %p499_p1 = scmp.lt.s32.totalorder %s17_s13, %s17_s13 }
   0x5   :  { %p495_p0 = scmp.ne.s32.totalorder %s17_s13, %s494_s14  ;;  %p500_p2 = scmp.lt.s32.totalorder %s494_s14, %s494_s14 }
   0x7   :  { %p501_p3 = por %p500_p2, %p499_p1 }
   0x9   :  { %p502_p4 = pnand %p501_p3, %p495_p0 }
   0xb   :  { %505 = shalt.err (!%p502_p4)
}
   0xc   :  { %s553_s15 = smov 128   ;;  %s554_s16 = smov 8  }
   0xd   :  { %22 = dma.hbm_to_vmem [thread:$0]  %s631_s0, 4096, %s17_s13, [#allocation3], %s553_s15, %s553_s15, %s554_s16  }
   0xe   :  { %s555_s19 = smov [#allocation5]  }
   0xf   :  { %s28_s20 = sshll.u32 %s555_s19, 4  ;;  %s29_s20 = int_to_ptr.vmem [resolvable:$true] %s28_s20 }
  0x10   :  { %s514_s21 = scalar_lea.vmem %s29_s20, 1024  ;;  %p519_p6 = scmp.lt.s32.totalorder %s29_s20, %s29_s20 }
  0x11   :  { %p515_p5 = scmp.ne.s32.totalorder %s29_s20, %s514_s21  ;;  %p520_p7 = scmp.lt.s32.totalorder %s514_s21, %s514_s21 }
  0x13   :  { %p521_p8 = por %p520_p7, %p519_p6 }
  0x15   :  { %p522_p9 = pnand %p521_p8, %p515_p5 }
  0x17   :  { %525 = shalt.err (!%p522_p9)
}
  0x18   :  { %s556_s22 = smov 64   ;;  %s557_s23 = smov 4  }
  0x19   :  { %34 = dma.hbm_to_vmem [thread:$0]  %s632_s1, 1024, %s29_s20, [#allocation6], %s556_s22, %s556_s22, %s557_s23  }
  0x1a   :  { %546 = dma.done.wait [#allocation3], 4096  }
  0x1b   :  { %547 = vsyncadd [#allocation3], 4294963200 }
  0x1c   :  { %548 = dma.done.wait [#allocation6], 1024  }
  0x1d   :  { %549 = vsyncadd [#allocation6], 4294966272  ;;  %v478_v0 = vld [vmem:[#allocation5 + $0x38] sm:$0xff]   ;;  %v479_v1 = vld [vmem:[#allocation5 + $0x30] sm:$0xff]  }
  0x1e   :  { %407 = vmatprep.subr.bf16.mxu0 %v478_v0  ;;  %455 = vmatprep.subr.bf16.mxu1 %v478_v0  ;;  %v480_v2 = vld [vmem:[#allocation5 + $0x28] sm:$0xff]   ;;  %v481_v3 = vld [vmem:[#allocation5 + $0x20] sm:$0xff]   ;;  %v482_v10 = vld [vmem:[#allocation5 + $0x18] sm:$0xff]  }
  0x1f   :  { %408 = vmatpush3.bf16.msra.mxu0 %v478_v0  ;;  %463 = vmatpush3.bf16.msra.mxu1 %v478_v0  ;;  %v44_v4 = vld [vmem:[#allocation2] sm:$0xff]  ;;  %v45_v5 = vld [vmem:[#allocation2 + $0x8] sm:$0xff]  ;;  %v483_v11 = vld [vmem:[#allocation5 + $0x10] sm:$0xff]  }
  0x20   :  { %409 = vmatprep.subr.bf16.mxu0 %v479_v1  ;;  %456 = vmatprep.subr.bf16.mxu1 %v479_v1  ;;  %v60_v6 = vld [vmem:[#allocation2 + $0x80] sm:$0xff]  ;;  %v76_v7 = vpack.c.bf16 %v45_v5, %v44_v4  ;;  %v61_v8 = vld [vmem:[#allocation2 + $0x88] sm:$0xff]  ;;  %v46_v14 = vld [vmem:[#allocation2 + $0x10] sm:$0xff] }
  0x21   :  { %v84_v9 = vpack.c.bf16 %v61_v8, %v60_v6  ;;  %v484_v12 = vld [vmem:[#allocation5 + $0x8] sm:$0xff]   ;;  %v485_v13 = vld [vmem:[#allocation5] sm:$0xff]   ;;  %v47_v15 = vld [vmem:[#allocation2 + $0x18] sm:$0xff] }
  0x22   :  { %423 = vmatprep.mubr.bf16.mxu0 %v76_v7  ;;  %v62_v16 = vld [vmem:[#allocation2 + $0x90] sm:$0xff]  ;;  %v63_v17 = vld [vmem:[#allocation2 + $0x98] sm:$0xff]  ;;  %v48_v18 = vld [vmem:[#allocation2 + $0x20] sm:$0xff]  ;;  %v77_v22 = vpack.c.bf16 %v47_v15, %v46_v14 }
  0x23   :  { %410 = vmatpush3.bf16.msra.mxu0 %v479_v1  ;;  %464 = vmatpush3.bf16.msra.mxu1 %v479_v1  ;;  %v49_v19 = vld [vmem:[#allocation2 + $0x28] sm:$0xff]  ;;  %v64_v20 = vld [vmem:[#allocation2 + $0xa0] sm:$0xff]  ;;  %v85_v23 = vpack.c.bf16 %v63_v17, %v62_v16  ;;  %v50_v26 = vld [vmem:[#allocation2 + $0x30] sm:$0xff] }
  0x24   :  { %411 = vmatprep.subr.bf16.mxu0 %v480_v2  ;;  %457 = vmatprep.subr.bf16.mxu1 %v480_v2  ;;  %v65_v21 = vld [vmem:[#allocation2 + $0xa8] sm:$0xff]  ;;  %v78_v24 = vpack.c.bf16 %v49_v19, %v48_v18  ;;  %v51_v27 = vld [vmem:[#allocation2 + $0x38] sm:$0xff]  ;;  %v66_v28 = vld [vmem:[#allocation2 + $0xb0] sm:$0xff] }
  0x25   :  { %439 = vmatprep.mubr.bf16.mxu1 %v84_v9  ;;  %v86_v25 = vpack.c.bf16 %v65_v21, %v64_v20  ;;  %v67_v29 = vld [vmem:[#allocation2 + $0xb8] sm:$0xff]  ;;  %v52_v30 = vld [vmem:[#allocation2 + $0x40] sm:$0xff]  ;;  %v53_v31 = vld [vmem:[#allocation2 + $0x48] sm:$0xff]  ;;  %v79_v34 = vpack.c.bf16 %v51_v27, %v50_v26 }
  0x26   :  { %v68_v32 = vld [vmem:[#allocation2 + $0xc0] sm:$0xff]  ;;  %v69_v33 = vld [vmem:[#allocation2 + $0xc8] sm:$0xff]  ;;  %v87_v35 = vpack.c.bf16 %v67_v29, %v66_v28  ;;  %v80_v36 = vpack.c.bf16 %v53_v31, %v52_v30  ;;  %v54_v38 = vld [vmem:[#allocation2 + $0x50] sm:$0xff] }
  0x27   :  { %412 = vmatpush3.bf16.msra.mxu0 %v480_v2  ;;  %465 = vmatpush3.bf16.msra.mxu1 %v480_v2  ;;  %v88_v37 = vpack.c.bf16 %v69_v33, %v68_v32  ;;  %v55_v39 = vld [vmem:[#allocation2 + $0x58] sm:$0xff]  ;;  %v70_v40 = vld [vmem:[#allocation2 + $0xd0] sm:$0xff]  ;;  %v56_v42 = vld [vmem:[#allocation2 + $0x60] sm:$0xff] }
  0x28   :  { %413 = vmatprep.subr.bf16.mxu0 %v481_v3  ;;  %458 = vmatprep.subr.bf16.mxu1 %v481_v3  ;;  %v71_v41 = vld [vmem:[#allocation2 + $0xd8] sm:$0xff]  ;;  %v57_v43 = vld [vmem:[#allocation2 + $0x68] sm:$0xff]  ;;  %v72_v44 = vld [vmem:[#allocation2 + $0xe0] sm:$0xff]  ;;  %v81_v46 = vpack.c.bf16 %v55_v39, %v54_v38 }
  0x29   :  { %v73_v45 = vld [vmem:[#allocation2 + $0xe8] sm:$0xff]  ;;  %v89_v47 = vpack.c.bf16 %v71_v41, %v70_v40  ;;  %v82_v48 = vpack.c.bf16 %v57_v43, %v56_v42  ;;  %v58_v50 = vld [vmem:[#allocation2 + $0x70] sm:$0xff]  ;;  %v59_v51 = vld [vmem:[#allocation2 + $0x78] sm:$0xff] }
  0x2a   :  { %v90_v49 = vpack.c.bf16 %v73_v45, %v72_v44  ;;  %v74_v52 = vld [vmem:[#allocation2 + $0xf0] sm:$0xff]  ;;  %v75_v53 = vld [vmem:[#allocation2 + $0xf8] sm:$0xff]  ;;  %v83_v54 = vpack.c.bf16 %v59_v51, %v58_v50  ;;  %v591_v56 = vld [vmem:[%s633_s2] ss:$0 sm:$0xff]  ;;  %s558_s2 = smov [#allocation7]  }
  0x2b   :  { %414 = vmatpush3.bf16.msra.mxu0 %v481_v3  ;;  %466 = vmatpush3.bf16.msra.mxu1 %v481_v3  ;;  %v91_v55 = vpack.c.bf16 %v75_v53, %v74_v52  ;;  %s361_s26 = sshll.u32 %s558_s2, 4  ;;  %s362_s26 = int_to_ptr.vmem [resolvable:$true] %s361_s26 }
  0x2c   :  { %415 = vmatprep.subr.bf16.mxu0 %v482_v10  ;;  %459 = vmatprep.subr.bf16.mxu1 %v482_v10  ;;  %s526_s27 = scalar_lea.vmem %s362_s26, 4096  ;;  %p531_p11 = scmp.lt.s32.totalorder %s362_s26, %s362_s26 }
  0x2d   :  { %p527_p10 = scmp.ne.s32.totalorder %s362_s26, %s526_s27  ;;  %p532_p12 = scmp.lt.s32.totalorder %s526_s27, %s526_s27 }
  0x2f   :  { %416 = vmatpush3.bf16.msra.mxu0 %v482_v10  ;;  %467 = vmatpush3.bf16.msra.mxu1 %v482_v10  ;;  %p533_p13 = por %p532_p12, %p531_p11 }
  0x30   :  { %417 = vmatprep.subr.bf16.mxu0 %v483_v11  ;;  %460 = vmatprep.subr.bf16.mxu1 %v483_v11 }
  0x31   :  { %p534_p0 = pnand %p533_p13, %p527_p10 }
  0x33   :  { %418 = vmatpush3.bf16.msra.mxu0 %v483_v11  ;;  %468 = vmatpush3.bf16.msra.mxu1 %v483_v11 }
  0x34   :  { %419 = vmatprep.subr.bf16.mxu0 %v484_v12  ;;  %461 = vmatprep.subr.bf16.mxu1 %v484_v12 }
  0x37   :  { %420 = vmatpush3.bf16.msra.mxu0 %v484_v12  ;;  %469 = vmatpush3.bf16.msra.mxu1 %v484_v12 }
  0x38   :  { %421 = vmatprep.subr.bf16.mxu0 %v485_v13  ;;  %462 = vmatprep.subr.bf16.mxu1 %v485_v13 }
  0x3b   :  { %422 = vmatpush3.bf16.msra.mxu0 %v485_v13  ;;  %470 = vmatpush3.bf16.msra.mxu1 %v485_v13 }
  0x3e   :  { %424 = vmatmul.mubr.bf16.vlgmr.msra.gmra.mxu0 %v77_v22  ;;  %440 = vmatmul.mubr.bf16.vlgmr.msra.gmra.mxu1 %v85_v23 }
  0x3f   :  { %427 = vmatprep.mubr.bf16.mxu0 %v78_v24  ;;  %443 = vmatprep.mubr.bf16.mxu1 %v86_v25 }
  0x46   :  { %428 = vmatmul.mubr.bf16.gmra.mxu0 %v79_v34  ;;  %444 = vmatmul.mubr.bf16.gmra.mxu1 %v87_v35 }
  0x47   :  { %431 = vmatprep.mubr.bf16.mxu0 %v80_v36  ;;  %447 = vmatprep.mubr.bf16.mxu1 %v88_v37 }
  0x4e   :  { %432 = vmatmul.mubr.bf16.gmra.mxu0 %v81_v46  ;;  %448 = vmatmul.mubr.bf16.gmra.mxu1 %v89_v47 }
  0x4f   :  { %435 = vmatprep.mubr.bf16.mxu0 %v82_v48  ;;  %451 = vmatprep.mubr.bf16.mxu1 %v90_v49 }
  0x56   :  { %436 = vmatmul.mubr.bf16.gmra.mxu0 %v83_v54  ;;  %452 = vmatmul.mubr.bf16.gmra.mxu1 %v91_v55 }
  0xfe   :  { %v425_v57 = vpop.f32.mrf.mxu0  ;;  %v441_v58 = vpop.f32.mrf.mxu1 }
  0xff   :  { %v206_v59 = vadd.f32 %v425_v57, %v591_v56  ;;  %v270_v60 = vadd.f32 %v441_v58, %v591_v56 }
 0x100   :  { %v197_v61 = vpop.f32.mrf.mxu0  ;;  %v261_v62 = vpop.f32.mrf.mxu1 }
 0x101   :  { %326 = vst [vmem:[#allocation7 + $0x10] sm:$0xff] %v206_v59  ;;  %342 = vst [vmem:[#allocation7 + $0x90] sm:$0xff] %v270_v60  ;;  %v198_v63 = vadd.f32 %v591_v56, %v197_v61  ;;  %v262_v0 = vadd.f32 %v591_v56, %v261_v62 }
 0x102   :  { %v426_v1 = vpop.f32.mrf.mxu0  ;;  %v442_v2 = vpop.f32.mrf.mxu1 }
 0x103   :  { %324 = vst [vmem:[#allocation7] sm:$0xff] %v198_v63  ;;  %340 = vst [vmem:[#allocation7 + $0x80] sm:$0xff] %v262_v0  ;;  %v209_v3 = vadd.f32 %v426_v1, %v591_v56  ;;  %v273_v4 = vadd.f32 %v442_v2, %v591_v56 }
 0x104   :  { %v200_v5 = vpop.f32.mrf.mxu0  ;;  %v264_v6 = vpop.f32.mrf.mxu1 }
 0x105   :  { %327 = vst [vmem:[#allocation7 + $0x18] sm:$0xff] %v209_v3  ;;  %343 = vst [vmem:[#allocation7 + $0x98] sm:$0xff] %v273_v4  ;;  %v201_v7 = vadd.f32 %v591_v56, %v200_v5  ;;  %v265_v8 = vadd.f32 %v591_v56, %v264_v6 }
 0x106   :  { %v429_v9 = vpop.f32.mrf.mxu0  ;;  %v445_v10 = vpop.f32.mrf.mxu1 }
 0x107   :  { %325 = vst [vmem:[#allocation7 + $0x8] sm:$0xff] %v201_v7  ;;  %341 = vst [vmem:[#allocation7 + $0x88] sm:$0xff] %v265_v8  ;;  %v222_v11 = vadd.f32 %v429_v9, %v591_v56  ;;  %v286_v12 = vadd.f32 %v445_v10, %v591_v56 }
 0x108   :  { %v213_v13 = vpop.f32.mrf.mxu0  ;;  %v277_v14 = vpop.f32.mrf.mxu1 }
 0x109   :  { %330 = vst [vmem:[#allocation7 + $0x30] sm:$0xff] %v222_v11  ;;  %346 = vst [vmem:[#allocation7 + $0xb0] sm:$0xff] %v286_v12  ;;  %v214_v15 = vadd.f32 %v591_v56, %v213_v13  ;;  %v278_v16 = vadd.f32 %v591_v56, %v277_v14 }
 0x10a   :  { %v430_v17 = vpop.f32.mrf.mxu0  ;;  %v446_v18 = vpop.f32.mrf.mxu1 }
 0x10b   :  { %328 = vst [vmem:[#allocation7 + $0x20] sm:$0xff] %v214_v15  ;;  %344 = vst [vmem:[#allocation7 + $0xa0] sm:$0xff] %v278_v16  ;;  %v225_v19 = vadd.f32 %v430_v17, %v591_v56  ;;  %v289_v20 = vadd.f32 %v446_v18, %v591_v56 }
 0x10c   :  { %v216_v21 = vpop.f32.mrf.mxu0  ;;  %v280_v22 = vpop.f32.mrf.mxu1 }
 0x10d   :  { %331 = vst [vmem:[#allocation7 + $0x38] sm:$0xff] %v225_v19  ;;  %347 = vst [vmem:[#allocation7 + $0xb8] sm:$0xff] %v289_v20  ;;  %v217_v23 = vadd.f32 %v591_v56, %v216_v21  ;;  %v281_v24 = vadd.f32 %v591_v56, %v280_v22 }
 0x10e   :  { %v433_v25 = vpop.f32.mrf.mxu0  ;;  %v449_v26 = vpop.f32.mrf.mxu1 }
 0x10f   :  { %329 = vst [vmem:[#allocation7 + $0x28] sm:$0xff] %v217_v23  ;;  %345 = vst [vmem:[#allocation7 + $0xa8] sm:$0xff] %v281_v24  ;;  %v238_v27 = vadd.f32 %v433_v25, %v591_v56  ;;  %v302_v28 = vadd.f32 %v449_v26, %v591_v56 }
 0x110   :  { %v229_v29 = vpop.f32.mrf.mxu0  ;;  %v293_v30 = vpop.f32.mrf.mxu1 }
 0x111   :  { %334 = vst [vmem:[#allocation7 + $0x50] sm:$0xff] %v238_v27  ;;  %350 = vst [vmem:[#allocation7 + $0xd0] sm:$0xff] %v302_v28  ;;  %v230_v31 = vadd.f32 %v591_v56, %v229_v29  ;;  %v294_v32 = vadd.f32 %v591_v56, %v293_v30 }
 0x112   :  { %v434_v33 = vpop.f32.mrf.mxu0  ;;  %v450_v34 = vpop.f32.mrf.mxu1 }
 0x113   :  { %332 = vst [vmem:[#allocation7 + $0x40] sm:$0xff] %v230_v31  ;;  %348 = vst [vmem:[#allocation7 + $0xc0] sm:$0xff] %v294_v32  ;;  %v241_v35 = vadd.f32 %v434_v33, %v591_v56  ;;  %v305_v36 = vadd.f32 %v450_v34, %v591_v56 }
 0x114   :  { %v232_v37 = vpop.f32.mrf.mxu0  ;;  %v296_v38 = vpop.f32.mrf.mxu1 }
 0x115   :  { %335 = vst [vmem:[#allocation7 + $0x58] sm:$0xff] %v241_v35  ;;  %351 = vst [vmem:[#allocation7 + $0xd8] sm:$0xff] %v305_v36  ;;  %v233_v39 = vadd.f32 %v591_v56, %v232_v37  ;;  %v297_v40 = vadd.f32 %v591_v56, %v296_v38 }
 0x116   :  { %v437_v41 = vpop.f32.mrf.mxu0  ;;  %v453_v42 = vpop.f32.mrf.mxu1 }
 0x117   :  { %333 = vst [vmem:[#allocation7 + $0x48] sm:$0xff] %v233_v39  ;;  %349 = vst [vmem:[#allocation7 + $0xc8] sm:$0xff] %v297_v40  ;;  %v254_v43 = vadd.f32 %v437_v41, %v591_v56  ;;  %v318_v44 = vadd.f32 %v453_v42, %v591_v56 }
 0x118   :  { %v245_v45 = vpop.f32.mrf.mxu0  ;;  %v309_v46 = vpop.f32.mrf.mxu1 }
 0x119   :  { %338 = vst [vmem:[#allocation7 + $0x70] sm:$0xff] %v254_v43  ;;  %354 = vst [vmem:[#allocation7 + $0xf0] sm:$0xff] %v318_v44  ;;  %v246_v47 = vadd.f32 %v591_v56, %v245_v45  ;;  %v310_v48 = vadd.f32 %v591_v56, %v309_v46 }
 0x11a   :  { %v438_v49 = vpop.f32.mrf.mxu0  ;;  %v454_v50 = vpop.f32.mrf.mxu1 }
 0x11b   :  { %336 = vst [vmem:[#allocation7 + $0x60] sm:$0xff] %v246_v47  ;;  %352 = vst [vmem:[#allocation7 + $0xe0] sm:$0xff] %v310_v48  ;;  %v257_v51 = vadd.f32 %v438_v49, %v591_v56  ;;  %v321_v52 = vadd.f32 %v454_v50, %v591_v56 }
 0x11c   :  { %v248_v53 = vpop.f32.mrf.mxu0  ;;  %v312_v54 = vpop.f32.mrf.mxu1 }
 0x11d   :  { %339 = vst [vmem:[#allocation7 + $0x78] sm:$0xff] %v257_v51  ;;  %355 = vst [vmem:[#allocation7 + $0xf8] sm:$0xff] %v321_v52  ;;  %v249_v55 = vadd.f32 %v591_v56, %v248_v53  ;;  %v313_v57 = vadd.f32 %v591_v56, %v312_v54 }
 0x11f   :  { %337 = vst [vmem:[#allocation7 + $0x68] sm:$0xff] %v249_v55  ;;  %353 = vst [vmem:[#allocation7 + $0xe8] sm:$0xff] %v313_v57 }
 0x120   :  { %537 = shalt.err (!%p534_p0)
}
 0x121   :  { %367 = dma.vmem_to_hbm [thread:$0]  %s362_s26, 4096, %s634_s3, [#allocation4], %s553_s15, %s553_s15, %s554_s16  }
 0x122   :  { %550 = dma.done.wait [#allocation4], 4096  }
 0x123   :  { %551 = vsyncadd [#allocation4], 4294963200 }
 0x124   :  { %371 = vsyncpa [#allocation3], 1 }
 0x125   :  { %372 = vsyncpa [#allocation6], 1 }
 0x126   :  { %373 = vsyncpa [#allocation4], 1 }

</bundles_post_ra>
